<compile_context>
chip_gen: v7x
topology: tpu7x:2x2x1
jax: 0.10.0
libtpu: 0.0.40
codegen_flags: <defaults>
</compile_context>

<pallas_src>
import jax
import jax.numpy as jnp
from jax import lax
from jax.experimental import pallas as pl
from jax.experimental.pallas import tpu as pltpu


# --------------------------------------------------------------------------- #
# In-kernel building blocks (operate on values, shared by both kernel paths). #
# --------------------------------------------------------------------------- #
def _shared_mlp(v, w1t, w2t):
    """v: (nb, C) f32; w1t: (C, Ch); w2t: (Ch, C) (bf16). f32 accumulation."""
    mmdt = w1t.dtype
    h = jnp.maximum(
        jnp.dot(v.astype(mmdt), w1t, preferred_element_type=jnp.float32), 0.0)
    return jnp.dot(h.astype(mmdt), w2t, preferred_element_type=jnp.float32)


def _channel_attention(x, w1t, w2t):
    """x: (nb, C, HW) in the input dtype -> y = x * sigmoid(MLP(avg)+MLP(max))."""
    # Lane-axis reductions with f32 accumulation.  (Moving the mean onto the MXU
    # via a ones/HW column is a further option if the XLU slot ever binds.)
    avg = jnp.mean(x, axis=2, dtype=jnp.float32)               # (nb, C)
    mx = jnp.max(x, axis=2).astype(jnp.float32)                # (nb, C)
    catt = jax.nn.sigmoid(_shared_mlp(avg, w1t, w2t) + _shared_mlp(mx, w1t, w2t))
    return x * catt.astype(x.dtype)[:, :, None]                # input dtype


# --------------------------------------------------------------------------- #
# Fused kernel (dense-K spatial conv on the MXU).                             #
# --------------------------------------------------------------------------- #
def _cbam_fused_kernel(x_ref, w1t_ref, w2t_ref, km_ref, kx_ref, cb_ref, o_ref):
    # x_ref : (nb, C, HW)  lane-dense block of nb samples (input dtype)
    # w1t   : (C, Ch) bf16     w2t: (Ch, C) bf16
    # km/kx : (HW, HW) bf16    dense 7x7 pad-3 conv matrix, mean / max halves
    # cb    : (1,) SMEM f32    conv bias
    x = x_ref[...]
    mmdt = km_ref.dtype

    # ---------------- channel attention ----------------
    y = _channel_attention(x, w1t_ref[...], w2t_ref[...])       # (nb, C, HW)

    # ---------------- spatial attention -----------------
    mean_c = jnp.mean(y, axis=1, dtype=jnp.float32)              # (nb, HW)
    max_c = jnp.max(y, axis=1).astype(jnp.float32)               # (nb, HW)
    conv = (jnp.dot(mean_c.astype(mmdt), km_ref[...],
                    preferred_element_type=jnp.float32)
            + jnp.dot(max_c.astype(mmdt), kx_ref[...],
                      preferred_element_type=jnp.float32))       # (nb, HW) f32
    satt = jax.nn.sigmoid(conv + cb_ref[0])

    o_ref[...] = (y * satt.astype(x.dtype)[:, None, :]).astype(o_ref.dtype)


# --------------------------------------------------------------------------- #
# Fallback kernels (feature map too large for the dense-K rewrite).           #
# --------------------------------------------------------------------------- #
def _cbam_channel_kernel(x_ref, w1t_ref, w2t_ref, y_ref, pooled_ref):
    x = x_ref[...]
    y = _channel_attention(x, w1t_ref[...], w2t_ref[...])
    y_ref[...] = y.astype(y_ref.dtype)
    mean_c = jnp.mean(y, axis=1, dtype=jnp.float32)              # (nb, HW)
    max_c = jnp.max(y, axis=1).astype(jnp.float32)               # (nb, HW)
    pooled_ref[:, 0, :] = mean_c.astype(pooled_ref.dtype)
    pooled_ref[:, 1, :] = max_c.astype(pooled_ref.dtype)


def _cbam_apply_spatial_kernel(y_ref, conv_ref, cb_ref, o_ref):
    y = y_ref[...]
    satt = jax.nn.sigmoid(conv_ref[...] + cb_ref[0])             # (nb, 1, HW) f32
    o_ref[...] = (y * satt.astype(y.dtype)).astype(o_ref.dtype)


# --------------------------------------------------------------------------- #
# Wrapper helpers.                                                            #
# --------------------------------------------------------------------------- #
def _vmem_capacity_bytes():
    try:
        cap = getattr(pltpu.get_tpu_info(), "vmem_capacity_bytes", None)
        if cap:
            return int(cap)
    except Exception:
        pass
    return 64 * 1024 * 1024   # conservative: v7x per-TensorCore VMEM


def _choose_batch_block(n, sample_bytes, resident_bytes, budget_bytes, target_bytes):
    """Samples per grid step: as large as the target / VMEM budget allows, a
    multiple of 8 when possible, and small enough that the grid has >= 2 steps
    (both TensorCores get work on v7x megacore)."""
    per_sample = 7 * sample_bytes          # 2x in + 2x out (double-buffered) + ~3 temps
    avail = max(budget_bytes - resident_bytes, per_sample)
    nb = max(1, min(target_bytes // sample_bytes, avail // per_sample, n))
    if n >= 2:
        nb = min(nb, pl.cdiv(n, 2))        # keep the grid length >= 2
    if nb >= 8:
        nb = (nb // 8) * 8                 # sublane-aligned batch rows
    return max(1, int(nb))


def _conv7x7_as_matrix(conv_w, H, W):
    """conv_w: (1, 2, 7, 7) -> K: (2*H*W, H*W) f32 so that
    [mean_flat ; max_flat] @ K == zero-padded 7x7 conv (bias excluded)."""
    w = conv_w.reshape(2, 7, 7).astype(jnp.float32)
    ii = jnp.arange(H).reshape(H, 1, 1, 1)    # input row
    ji = jnp.arange(W).reshape(1, W, 1, 1)    # input col
    io = jnp.arange(H).reshape(1, 1, H, 1)    # output row
    jo = jnp.arange(W).reshape(1, 1, 1, W)    # output col
    ky = ii - io + 3
    kx = ji - jo + 3
    valid = (ky >= 0) & (ky < 7) & (kx >= 0) & (kx < 7)
    wv = w[:, jnp.clip(ky, 0, 6), jnp.clip(kx, 0, 6)]            # (2, H, W, H, W)
    k = jnp.where(valid[None], wv, 0.0)
    return k.reshape(2 * H * W, H * W)


# --------------------------------------------------------------------------- #
# Public entry point.                                                         #
# --------------------------------------------------------------------------- #
def cbam(x, w1, w2, conv_w, conv_b, *, block_bytes=None, matmul_dtype=jnp.bfloat16):
    """x: (N, C, H, W); w1: (Ch, C, 1, 1); w2: (C, Ch, 1, 1);
    conv_w: (1, 2, 7, 7); conv_b: (1,)"""
    N, C, H, W = x.shape
    HW = H * W
    Ch = w1.shape[0]
    itemsize = jnp.dtype(x.dtype).itemsize
    k_itemsize = jnp.dtype(matmul_dtype).itemsize

    # ---- generation-aware VMEM budget ----
    vmem_cap = _vmem_capacity_bytes()
    budget = int(vmem_cap * 0.65)              # per-step footprint target
    vmem_limit = int(vmem_cap * 0.80)          # scoped limit (headroom left)
    target = block_bytes if block_bytes is not None else 12 * 1024 * 1024

    w1t = jnp.transpose(w1.reshape(Ch, C)).astype(matmul_dtype)   # (C, Ch)
    w2t = jnp.transpose(w2.reshape(C, Ch)).astype(matmul_dtype)   # (Ch, C)
    cb = conv_b.reshape(1).astype(jnp.float32)

    sample_bytes = C * HW * itemsize
    k_resident = 2 * (2 * HW * HW * k_itemsize)      # two K halves, double-buffered
    w_resident = 2 * (2 * C * Ch * k_itemsize)       # MLP weights, double-buffered

    x_flat = x.reshape(N, C, HW)
    compiler_params = pltpu.CompilerParams(
        dimension_semantics=("parallel",),
        vmem_limit_bytes=vmem_limit,
    )

    # Dense conv-as-matmul only when K leaves at least half the budget for blocks.
    use_dense_k = k_resident <= budget // 2

    if use_dense_k:
        nb = _choose_batch_block(N, sample_bytes, k_resident + w_resident, budget, target)
        n_pad = pl.cdiv(N, nb) * nb
        if n_pad != N:
            x_flat = jnp.pad(x_flat, ((0, n_pad - N), (0, 0), (0, 0)))

        kfull = _conv7x7_as_matrix(conv_w, H, W)                  # (2*HW, HW) f32
        k_mean = kfull[:HW].astype(matmul_dtype)                  # (HW, HW)
        k_max = kfull[HW:].astype(matmul_dtype)                   # (HW, HW)

        out_flat = pl.pallas_call(
            _cbam_fused_kernel,
            out_shape=jax.ShapeDtypeStruct((n_pad, C, HW), x.dtype),
            grid_spec=pltpu.PrefetchScalarGridSpec(
                num_scalar_prefetch=0,
                grid=(n_pad // nb,),
                in_specs=[
                    pl.BlockSpec((nb, C, HW), lambda n: (n, 0, 0)),
                    pl.BlockSpec((C, Ch), lambda n: (0, 0)),
                    pl.BlockSpec((Ch, C), lambda n: (0, 0)),
                    pl.BlockSpec((HW, HW), lambda n: (0, 0)),
                    pl.BlockSpec((HW, HW), lambda n: (0, 0)),
                    pl.BlockSpec(memory_space=pltpu.MemorySpace.SMEM),
                ],
                out_specs=pl.BlockSpec((nb, C, HW), lambda n: (n, 0, 0)),
            ),
            compiler_params=compiler_params,
        )(x_flat, w1t, w2t, k_mean, k_max, cb)
        return out_flat[:N].reshape(N, C, H, W)

    # ---- large-feature-map fallback: dense K would not fit in VMEM ----
    nb = _choose_batch_block(N, sample_bytes, w_resident, budget, target)
    n_pad = pl.cdiv(N, nb) * nb
    if n_pad != N:
        x_flat = jnp.pad(x_flat, ((0, n_pad - N), (0, 0), (0, 0)))

    y_flat, pooled = pl.pallas_call(
        _cbam_channel_kernel,
        out_shape=(jax.ShapeDtypeStruct((n_pad, C, HW), x.dtype),
                   jax.ShapeDtypeStruct((n_pad, 2, HW), jnp.float32)),
        grid_spec=pltpu.PrefetchScalarGridSpec(
            num_scalar_prefetch=0,
            grid=(n_pad // nb,),
            in_specs=[
                pl.BlockSpec((nb, C, HW), lambda n: (n, 0, 0)),
                pl.BlockSpec((C, Ch), lambda n: (0, 0)),
                pl.BlockSpec((Ch, C), lambda n: (0, 0)),
            ],
            out_specs=[
                pl.BlockSpec((nb, C, HW), lambda n: (n, 0, 0)),
                pl.BlockSpec((nb, 2, HW), lambda n: (n, 0, 0)),
            ],
        ),
        compiler_params=compiler_params,
    )(x_flat, w1t, w2t)

    # 7x7 conv on the tiny 2-channel pooled map stays in XLA (negligible work).
    conv = lax.conv_general_dilated(
        pooled.reshape(n_pad, 2, H, W), conv_w.astype(jnp.float32),
        window_strides=(1, 1), padding=[(3, 3), (3, 3)],
        dimension_numbers=("NCHW", "OIHW", "NCHW")).reshape(n_pad, 1, HW)

    out_flat = pl.pallas_call(
        _cbam_apply_spatial_kernel,
        out_shape=jax.ShapeDtypeStruct((n_pad, C, HW), x.dtype),
        grid_spec=pltpu.PrefetchScalarGridSpec(
            num_scalar_prefetch=0,
            grid=(n_pad // nb,),
            in_specs=[
                pl.BlockSpec((nb, C, HW), lambda n: (n, 0, 0)),
                pl.BlockSpec((nb, 1, HW), lambda n: (n, 0, 0)),
                pl.BlockSpec(memory_space=pltpu.MemorySpace.SMEM),
            ],
            out_specs=pl.BlockSpec((nb, C, HW), lambda n: (n, 0, 0)),
        ),
        compiler_params=compiler_params,
    )(y_flat, conv, cb)
    return out_flat[:N].reshape(N, C, H, W)


# --------------------------------------------------------------------------- #
# Pure-JAX reference (matches the PyTorch forward exactly, in f32).           #
# --------------------------------------------------------------------------- #
def cbam_ref(x, w1, w2, conv_w, conv_b):
    N, C, H, W = x.shape
    Ch = w1.shape[0]
    w1m = w1.reshape(Ch, C)
    w2m = w2.reshape(C, Ch)

    def mlp(v):                                  # v: (N, C)
        h = jnp.maximum(v @ w1m.T, 0.0)
        return h @ w2m.T

    avg = jnp.mean(x, axis=(2, 3))
    mx = jnp.max(x, axis=(2, 3))
    catt = jax.nn.sigmoid(mlp(avg) + mlp(mx))    # (N, C)
    y = x * catt[:, :, None, None]

    mean_c = jnp.mean(y, axis=1, keepdims=True)
    max_c = jnp.max(y, axis=1, keepdims=True)
    inp = jnp.concatenate([mean_c, max_c], axis=1)        # (N, 2, H, W)
    conv = lax.conv_general_dilated(
        inp, conv_w, window_strides=(1, 1), padding=[(3, 3), (3, 3)],
        dimension_numbers=("NCHW", "OIHW", "NCHW"))
    satt = jax.nn.sigmoid(conv + conv_b.reshape(1, 1, 1, 1))
    return y * satt


if __name__ == "__main__":
    key = jax.random.PRNGKey(0)
    k1, k2, k3, k4, k5 = jax.random.split(key, 5)

    N, C, H, W = 2, 32, 16, 16
    ratio = 16
    Ch = C // ratio

    x = jax.random.normal(k1, (N, C, H, W), jnp.float32)
    w1 = jax.random.normal(k2, (Ch, C, 1, 1), jnp.float32) * 0.1
    w2 = jax.random.normal(k3, (C, Ch, 1, 1), jnp.float32) * 0.1
    conv_w = jax.random.normal(k4, (1, 2, 7, 7), jnp.float32) * 0.1
    conv_b = jax.random.normal(k5, (1,), jnp.float32) * 0.1

    out = jax.block_until_ready(cbam(x, w1, w2, conv_w, conv_b))
    ref = cbam_ref(x, w1, w2, conv_w, conv_b)

    assert out.shape == (N, C, H, W)
    err = float(jnp.max(jnp.abs(out - ref)))
    # Matmul operands (K halves / MLP weights / pooled activations) run in bf16 on
    # the MXU with f32 accumulation -> small, bounded deviation from exact f32.
    assert jnp.allclose(out, ref, atol=3e-2, rtol=3e-2), err

    print("KERNEL_OK")
</pallas_src>

<mosaic_0001>
module attributes {stable_mosaic.version = 11 : i64} {
  func.func @_cbam_fused_kernel(%arg0: i32, %arg1: memref<1x32x256xf32, #tpu.memory_space<vmem>>, %arg2: memref<32x2xbf16, #tpu.memory_space<vmem>>, %arg3: memref<2x32xbf16, #tpu.memory_space<vmem>>, %arg4: memref<256x256xbf16, #tpu.memory_space<vmem>>, %arg5: memref<256x256xbf16, #tpu.memory_space<vmem>>, %arg6: memref<1xf32, #tpu.memory_space<smem>>, %arg7: memref<1x32x256xf32, #tpu.memory_space<vmem>>) attributes {dimension_semantics = [#tpu.dimension_semantics<parallel>], iteration_bounds = array<i64: 2>, scalar_prefetch = 0 : i64, scratch_operands = 0 : i64, tpu.core_type = #tpu.core_type<tc>, window_params = [{transform_indices = @transform_0, window_bounds = array<i64: 1, 32, 256>}, {pipeline_mode = #tpu.pipeline_mode<synchronous>, transform_indices = @transform_1, window_bounds = array<i64: 32, 2>}, {pipeline_mode = #tpu.pipeline_mode<synchronous>, transform_indices = @transform_2, window_bounds = array<i64: 2, 32>}, {pipeline_mode = #tpu.pipeline_mode<synchronous>, transform_indices = @transform_3, window_bounds = array<i64: 256, 256>}, {pipeline_mode = #tpu.pipeline_mode<synchronous>, transform_indices = @transform_4, window_bounds = array<i64: 256, 256>}, {transform_indices = @transform_5, window_bounds = array<i64: 1>}, {transform_indices = @transform_6, window_bounds = array<i64: 1, 32, 256>}]} {
    %c0 = arith.constant 0 : index
    %c0_0 = arith.constant 0 : index
    %c0_1 = arith.constant 0 : index
    %0 = vector.load %arg1[%c0, %c0_0, %c0_1] : memref<1x32x256xf32, #tpu.memory_space<vmem>>, vector<1x32x256xf32>
    %c0_2 = arith.constant 0 : index
    %c0_3 = arith.constant 0 : index
    %1 = vector.load %arg2[%c0_2, %c0_3] : memref<32x2xbf16, #tpu.memory_space<vmem>>, vector<32x2xbf16>
    %c0_4 = arith.constant 0 : index
    %c0_5 = arith.constant 0 : index
    %2 = vector.load %arg3[%c0_4, %c0_5] : memref<2x32xbf16, #tpu.memory_space<vmem>>, vector<2x32xbf16>
    %cst = arith.constant dense<0.000000e+00> : vector<1x32xf32>
    %3 = vector.multi_reduction <add>, %0, %cst [2] : vector<1x32x256xf32> to vector<1x32xf32>
    %cst_6 = arith.constant 2.560000e+02 : f32
    %4 = vector.broadcast %cst_6 : f32 to vector<1x32xf32>
    %5 = arith.divf %3, %4 : vector<1x32xf32>
    %cst_7 = arith.constant dense<0xFF800000> : vector<1x32xf32>
    %6 = vector.multi_reduction <maximumf>, %0, %cst_7 [2] : vector<1x32x256xf32> to vector<1x32xf32>
    %7 = arith.truncf %5 : vector<1x32xf32> to vector<1x32xbf16>
    %cst_8 = arith.constant dense<0.000000e+00> : vector<1x2xf32>
    %8 = tpu.matmul %7, %1, %cst_8 {dimension_numbers = #tpu.dot_dimension_numbers<[1], [0], [0], [1], [0, 0, 1, 1], [], []>} : vector<1x32xbf16>, vector<32x2xbf16>, vector<1x2xf32> -> vector<1x2xf32>
    %cst_9 = arith.constant 0.000000e+00 : f32
    %9 = vector.broadcast %cst_9 : f32 to vector<1x2xf32>
    %10 = arith.maximumf %8, %9 : vector<1x2xf32>
    %11 = arith.truncf %10 : vector<1x2xf32> to vector<1x2xbf16>
    %cst_10 = arith.constant dense<0.000000e+00> : vector<1x32xf32>
    %12 = tpu.matmul %11, %2, %cst_10 {dimension_numbers = #tpu.dot_dimension_numbers<[1], [0], [0], [1], [0, 0, 1, 1], [], []>} : vector<1x2xbf16>, vector<2x32xbf16>, vector<1x32xf32> -> vector<1x32xf32>
    %13 = arith.truncf %6 : vector<1x32xf32> to vector<1x32xbf16>
    %cst_11 = arith.constant dense<0.000000e+00> : vector<1x2xf32>
    %14 = tpu.matmul %13, %1, %cst_11 {dimension_numbers = #tpu.dot_dimension_numbers<[1], [0], [0], [1], [0, 0, 1, 1], [], []>} : vector<1x32xbf16>, vector<32x2xbf16>, vector<1x2xf32> -> vector<1x2xf32>
    %cst_12 = arith.constant 0.000000e+00 : f32
    %15 = vector.broadcast %cst_12 : f32 to vector<1x2xf32>
    %16 = arith.maximumf %14, %15 : vector<1x2xf32>
    %17 = arith.truncf %16 : vector<1x2xf32> to vector<1x2xbf16>
    %cst_13 = arith.constant dense<0.000000e+00> : vector<1x32xf32>
    %18 = tpu.matmul %17, %2, %cst_13 {dimension_numbers = #tpu.dot_dimension_numbers<[1], [0], [0], [1], [0, 0, 1, 1], [], []>} : vector<1x2xbf16>, vector<2x32xbf16>, vector<1x32xf32> -> vector<1x32xf32>
    %19 = arith.addf %12, %18 : vector<1x32xf32>
    %20 = arith.negf %19 : vector<1x32xf32>
    %21 = math.exp %20 : vector<1x32xf32>
    %cst_14 = arith.constant 1.000000e+00 : f32
    %22 = vector.broadcast %cst_14 : f32 to vector<1x32xf32>
    %23 = arith.addf %22, %21 : vector<1x32xf32>
    %24 = arith.divf %22, %23 : vector<1x32xf32>
    %25 = vector.shape_cast %24 : vector<1x32xf32> to vector<1x32x1xf32>
    %26 = vector.broadcast %25 : vector<1x32x1xf32> to vector<1x32x256xf32>
    %27 = arith.mulf %0, %26 : vector<1x32x256xf32>
    %cst_15 = arith.constant dense<0.000000e+00> : vector<1x256xf32>
    %28 = vector.multi_reduction <add>, %27, %cst_15 [1] : vector<1x32x256xf32> to vector<1x256xf32>
    %cst_16 = arith.constant 3.200000e+01 : f32
    %29 = vector.broadcast %cst_16 : f32 to vector<1x256xf32>
    %30 = arith.divf %28, %29 : vector<1x256xf32>
    %cst_17 = arith.constant dense<0xFF800000> : vector<1x256xf32>
    %31 = vector.multi_reduction <maximumf>, %27, %cst_17 [1] : vector<1x32x256xf32> to vector<1x256xf32>
    %32 = arith.truncf %30 : vector<1x256xf32> to vector<1x256xbf16>
    %c0_18 = arith.constant 0 : index
    %c0_19 = arith.constant 0 : index
    %33 = vector.load %arg4[%c0_18, %c0_19] : memref<256x256xbf16, #tpu.memory_space<vmem>>, vector<256x256xbf16>
    %cst_20 = arith.constant dense<0.000000e+00> : vector<1x256xf32>
    %34 = tpu.matmul %32, %33, %cst_20 {dimension_numbers = #tpu.dot_dimension_numbers<[1], [0], [0], [1], [0, 0, 1, 1], [], []>} : vector<1x256xbf16>, vector<256x256xbf16>, vector<1x256xf32> -> vector<1x256xf32>
    %35 = arith.truncf %31 : vector<1x256xf32> to vector<1x256xbf16>
    %c0_21 = arith.constant 0 : index
    %c0_22 = arith.constant 0 : index
    %36 = vector.load %arg5[%c0_21, %c0_22] : memref<256x256xbf16, #tpu.memory_space<vmem>>, vector<256x256xbf16>
    %cst_23 = arith.constant dense<0.000000e+00> : vector<1x256xf32>
    %37 = tpu.matmul %35, %36, %cst_23 {dimension_numbers = #tpu.dot_dimension_numbers<[1], [0], [0], [1], [0, 0, 1, 1], [], []>} : vector<1x256xbf16>, vector<256x256xbf16>, vector<1x256xf32> -> vector<1x256xf32>
    %38 = arith.addf %34, %37 : vector<1x256xf32>
    %c0_24 = arith.constant 0 : index
    %39 = memref.load %arg6[%c0_24] : memref<1xf32, #tpu.memory_space<smem>>
    %40 = vector.broadcast %39 : f32 to vector<1x256xf32>
    %41 = arith.addf %38, %40 : vector<1x256xf32>
    %42 = arith.negf %41 : vector<1x256xf32>
    %43 = math.exp %42 : vector<1x256xf32>
    %cst_25 = arith.constant 1.000000e+00 : f32
    %44 = vector.broadcast %cst_25 : f32 to vector<1x256xf32>
    %45 = arith.addf %44, %43 : vector<1x256xf32>
    %46 = arith.divf %44, %45 : vector<1x256xf32>
    %47 = vector.shape_cast %46 : vector<1x256xf32> to vector<1x1x256xf32>
    %48 = vector.broadcast %47 : vector<1x1x256xf32> to vector<1x32x256xf32>
    %49 = arith.mulf %27, %48 : vector<1x32x256xf32>
    %c0_26 = arith.constant 0 : index
    %c0_27 = arith.constant 0 : index
    %c0_28 = arith.constant 0 : index
    %50 = vector.load %arg7[%c0_26, %c0_27, %c0_28] : memref<1x32x256xf32, #tpu.memory_space<vmem>>, vector<1x32x256xf32>
    tpu.vector_store %arg7[%c0_26, %c0_27, %c0_28], %49 {strides = array<i32>} : memref<1x32x256xf32, #tpu.memory_space<vmem>>, vector<1x32x256xf32>,
    return
  }
  func.func @transform_0(%arg0: i32) -> (i32, i32, i32) {
    %c0_i32 = arith.constant 0 : i32
    %c0_i32_0 = arith.constant 0 : i32
    %c0_i32_1 = arith.constant 0 : i32
    return %arg0, %c0_i32, %c0_i32_0 : i32, i32, i32
  }
  func.func @transform_1(%arg0: i32) -> (i32, i32) {
    %c0_i32 = arith.constant 0 : i32
    %c0_i32_0 = arith.constant 0 : i32
    %c0_i32_1 = arith.constant 0 : i32
    return %c0_i32, %c0_i32_0 : i32, i32
  }
  func.func @transform_2(%arg0: i32) -> (i32, i32) {
    %c0_i32 = arith.constant 0 : i32
    %c0_i32_0 = arith.constant 0 : i32
    %c0_i32_1 = arith.constant 0 : i32
    return %c0_i32, %c0_i32_0 : i32, i32
  }
  func.func @transform_3(%arg0: i32) -> (i32, i32) {
    %c0_i32 = arith.constant 0 : i32
    %c0_i32_0 = arith.constant 0 : i32
    %c0_i32_1 = arith.constant 0 : i32
    return %c0_i32, %c0_i32_0 : i32, i32
  }
  func.func @transform_4(%arg0: i32) -> (i32, i32) {
    %c0_i32 = arith.constant 0 : i32
    %c0_i32_0 = arith.constant 0 : i32
    %c0_i32_1 = arith.constant 0 : i32
    return %c0_i32, %c0_i32_0 : i32, i32
  }
  func.func @transform_5(%arg0: i32) -> i32 {
    %c0_i32 = arith.constant 0 : i32
    %c0_i32_0 = arith.constant 0 : i32
    return %c0_i32 : i32
  }
  func.func @transform_6(%arg0: i32) -> (i32, i32, i32) {
    %c0_i32 = arith.constant 0 : i32
    %c0_i32_0 = arith.constant 0 : i32
    %c0_i32_1 = arith.constant 0 : i32
    return %arg0, %c0_i32, %c0_i32_0 : i32, i32, i32
  }
}

</mosaic_0001>

<bundles_post_ra>
// kernel: tpu_custom_call.1
= control target key start
LH: loop header
LB: loop body
LE: loop exit
PB: predicated region body
PF: predicated region fallthrough
CT: control target
= control target key end

     0   :  { %s2184_s0 = inlined_call_operand.hbm [shape: f32[2,32,256], index: 0, kind: input, shape index: {}]   ;;  %s2185_s1 = inlined_call_operand.vmem [shape: bf16[32,2], index: 1, kind: input, shape index: {}]   ;;  %s2186_s2 = inlined_call_operand.vmem [shape: bf16[2,32], index: 2, kind: input, shape index: {}]   ;;  %s2187_s3 = inlined_call_operand.hbm [shape: bf16[256,256], index: 3, kind: input, shape index: {}]   ;;  %s2188_s4 = inlined_call_operand.hbm [shape: bf16[256,256], index: 4, kind: input, shape index: {}]   ;;  %s2189_s5 = inlined_call_operand.<no memory space> [shape: f32[1], index: 5, kind: input, shape index: {}]   ;;  %s2190_s6 = inlined_call_operand.hbm [shape: f32[2,32,256], index: 6, kind: output, shape index: {}]  }
   0x1   :  { %11 = sst [smem:[#allocation2]] %s2189_s5 }
   0x2   :  { %12 = vsyncpa [#allocation4], 0 }
   0x3   :  { %14 = vsyncpa [#allocation4 + $0x1], 0 }
   0x4   :  { %15 = vsyncpa [#allocation7], 0 }
   0x5   :  { %16 = vsyncpa [#allocation5], 0 }
   0x6   :  { %18 = vsyncpa [#allocation5 + $0x1], 0  ;;  %s1817_s23 = smov 0   ;;  %s1819_s24 = smov 0  }
   0x7   :  { %s1821_s25 = smov 0   ;;  %s1823_s26 = smov 0  }
   0x8 LB: > { %s1838_s5 = sadd.s32 4294967295, %s1765_s26   ;;  %s1289_s27 = sadd.s32 4294967294, %s1765_s26   ;;  %s1765_s26 = sphi %s1823_s26, %s2210_s26   ;;  %s1761_s25 = sphi %s1821_s25, %s2209_s25   ;;  %s1757_s24 = sphi %s1819_s24, %s2208_s24   ;;  %s1753_s23 = sphi %s1817_s23, %s2207_s23  }
   0x9   : > { %p44_p0 = scmp.ne.s32.totalorder %s1757_s24, %s1753_s23  ;;  %p2191_p1 = scmp.eq.s32.totalorder %s1838_s5, 0 }
   0xa   : > { %p179_p3 = scmp.eq.s32.totalorder %s1289_s27, 1  ;;  %p1290_p5 = scmp.ge.s32.totalorder %s1765_s26, 1 }
   0xb   : > { %p1847_p4 = por %p2191_p1, %p44_p0  ;;  %p186_p7 = scmp.lt.s32.totalorder %s1765_s26, 3 }
   0xc   : > { %p1852_p6 = por %p179_p3, %p44_p0  ;;  %s1767_s7 = smov [#allocation6]  }
   0xd   : > { %s2194_s28 = scalar_select %p1847_p4, 1, 0 }
   0xe   : > { %s2195_s29 = scalar_select %p1852_p6, 1, 0 }
   0xf   : > { %p1857_p8 = pnand %p1290_p5, %p186_p7  ;;  %s204_s8 = sshll.u32 %s1767_s7, 4  ;;  %s1861_s8 = int_to_ptr.vmem [resolvable:$true] %s204_s8 }
  0x10   : > { %s1768_s10 = smov [#allocation8]   ;;  %s1609_s14 = scalar_lea.hbm %s2187_s3, 4096 }
  0x11   : > { %p1436_p9 = pneg %p1857_p8  ;;  %s217_s11 = sshll.u32 %s1768_s10, 4  ;;  %s1872_s11 = int_to_ptr.vmem [resolvable:$true] %s217_s11 }
  0x12   : > { %p1610_p12 = scmp.ne.s32.totalorder %s2187_s3, %s1609_s14  ;;  %p1616_p5 = scmp.lt.u32.totalorder %s1609_s14, %s2187_s3 }
  0x13   : > { %p1868_p11 = pnand %p1436_p9, %p2191_p1 }
  0x15   : > { %p1611_p13 = pneg %p1868_p11 }
  0x17   : > { %p1612_p0 = pnand %p1611_p13, %p1610_p12 }
  0x19   : > { %p1613_p3 = pneg %p1612_p0 }
  0x1b   : > { %p1618_p7 = pnand %p1616_p5, %p1613_p3 }
  0x1d   : > { %1621 = shalt.err (!%p1618_p7)
}
  0x1e   : > { %s1622_s19 = scalar_lea.vmem %s1861_s8, 4096  ;;  %p1630_p2 = scmp.lt.s32.totalorder %s1861_s8, %s1861_s8 }
  0x1f   : > { %p1623_p9 = scmp.ne.s32.totalorder %s1861_s8, %s1622_s19  ;;  %p1631_p12 = scmp.lt.s32.totalorder %s1622_s19, %s1622_s19 }
  0x21   : > { %p1625_p10 = pnand %p1623_p9, %p1611_p13  ;;  %p1632_p0 = por %p1631_p12, %p1630_p2 }
  0x23   : > { %p1626_p1 = pneg %p1625_p10 }
  0x25   : > { %p1633_p6 = pnand %p1632_p0, %p1626_p1 }
  0x27   : > { %1636 = shalt.err (!%p1633_p6)
}
  0x28   : > { %s1769_s20 = smov 128   ;;  %s1770_s21 = smov 8  }
  0x29   : > { %1439 = dma.hbm_to_vmem [thread:$0]  (!%p1868_p11), %s2187_s3, 4096, %s1861_s8, [#allocation7], %s1769_s20, %s1769_s20, %s1770_s21  }
  0x2a   : > { %s1637_s12 = scalar_lea.hbm %s2188_s4, 4096 }
  0x2b   : > { %p1638_p2 = scmp.ne.s32.totalorder %s2188_s4, %s1637_s12  ;;  %p1644_p10 = scmp.lt.u32.totalorder %s1637_s12, %s2188_s4 }
  0x2d   : > { %p1640_p1 = pnand %p1638_p2, %p1611_p13 }
  0x2f   : > { %p1641_p6 = pneg %p1640_p1 }
  0x31   : > { %p1646_p3 = pnand %p1644_p10, %p1641_p6 }
  0x33   : > { %1649 = shalt.err (!%p1646_p3)
}
  0x34   : > { %s1650_s8 = scalar_lea.vmem %s1872_s11, 4096  ;;  %p1658_p12 = scmp.lt.s32.totalorder %s1872_s11, %s1872_s11 }
  0x35   : > { %p1651_p5 = scmp.ne.s32.totalorder %s1872_s11, %s1650_s8  ;;  %p1659_p0 = scmp.lt.s32.totalorder %s1650_s8, %s1650_s8 }
  0x37   : > { %p1653_p7 = pnand %p1651_p5, %p1611_p13  ;;  %p1660_p2 = por %p1659_p0, %p1658_p12 }
  0x39   : > { %p1654_p9 = pneg %p1653_p7 }
  0x3b   : > { %p1661_p1 = pnand %p1660_p2, %p1654_p9 }
  0x3d   : > { %1664 = shalt.err (!%p1661_p1)
}
  0x3e   : > { %1442 = dma.hbm_to_vmem [thread:$0]  (!%p1868_p11), %s2188_s4, 4096, %s1872_s11, [#allocation7], %s1769_s20, %s1769_s20, %s1770_s21  }
  0x3f   : > { %s1927_s19 = sadd.s32 1, %s1765_s26   ;;  %s31_s9 = sadd.s32 1, %s1761_s25 }
  0x40   : > { %s28_s22 = ssub.s32 %s1765_s26, %s1927_s19  ;;  %p38_p13 = scmp.ne.s32.totalorder %s1761_s25, %s1757_s24 }
  0x41   : > { %p29_p6 = scmp.eq.s32.totalorder %s28_s22, 0  ;;  %p39_p10 = scmp.eq.s32.totalorder %s1765_s26, 0 }
  0x42   : > { %p2198_p3 = scmp.eq.s32.totalorder %s1838_s5, 1  ;;  %p1453_p7 = scmp.lt.s32.totalorder %s1765_s26, 2 }
  0x43   : > { %s1943_s7 = scalar_select %p29_p6, %s1761_s25, %s31_s9  }
  0x44   : > { %p1937_p5 = por %p2198_p3, %p38_p13  ;;  %p40_p9 = por %p39_p10, %p38_p13 }
  0x45   : > { %s234_s10 = sand.u32 1, %s1761_s25   ;;  %s1380_s11 = sshll.u32 %s1765_s26, 10 }
  0x46   : > { %s2199_s27 = scalar_select %p1937_p5, 1, 0 }
  0x47   : > { %s1294_s12 = sshll.u32 %s234_s10, 6  ;;  %s1950_s13 = scalar_lea.hbm %s2184_s0, %s1380_s11 }
  0x48   : > { %s238_s14 = scalar_lea.vmem [#allocation3], %s1294_s12  ;;  %p1954_p11 = pnand %p1453_p7, %p40_p9 }
  0x49   : > { %s245_s15 = sshll.u32 %s238_s14, 4  ;;  %s1958_s8 = scalar_lea.sflag [#allocation4], %s234_s10  ;;  %s1952_s15 = int_to_ptr.vmem [resolvable:$true] %s245_s15 }
  0x4a   : > { %s1665_s17 = scalar_lea.hbm %s1950_s13, 1024  ;;  %p1667_p0 = pneg %p1954_p11 }
  0x4b   : > { %p1666_p12 = scmp.ne.s32.totalorder %s1950_s13, %s1665_s17  ;;  %s1670_s22 = scalar_lea.hbm %s2184_s0, 2048 }
  0x4c   : > { %p1671_p13 = scmp.lt.u32.totalorder %s1950_s13, %s2184_s0  ;;  %p1672_p6 = scmp.lt.u32.totalorder %s1670_s22, %s1665_s17 }
  0x4d   : > { %p1668_p2 = pnand %p1667_p0, %p1666_p12  ;;  %p1674_p3 = scmp.lt.u32.totalorder %s1665_s17, %s1950_s13 }
  0x4e   : > { %p1673_p10 = por %p1672_p6, %p1671_p13 }
  0x4f   : > { %p1669_p1 = pneg %p1668_p2 }
  0x50   : > { %p1675_p7 = por %p1674_p3, %p1673_p10 }
  0x52   : > { %p1676_p9 = pnand %p1675_p7, %p1669_p1 }
  0x54   : > { %1679 = shalt.err (!%p1676_p9)
}
  0x55   : > { %s1680_s10 = scalar_lea.vmem %s1952_s15, 1024  ;;  %s1771_s20 = smov [#allocation3]  }
  0x56   : > { %p1681_p12 = scmp.ne.s32.totalorder %s1952_s15, %s1680_s10  ;;  %s1685_s21 = sshll.u32 %s1771_s20, 4  ;;  %s1686_s21 = int_to_ptr.vmem [resolvable:$false] %s1685_s21 }
  0x57   : > { %s1687_s14 = scalar_lea.vmem %s1686_s21, 2048  ;;  %p1688_p4 = scmp.lt.s32.totalorder %s1952_s15, %s1686_s21 }
  0x58   : > { %p1683_p2 = pnand %p1681_p12, %p1667_p0  ;;  %p1689_p13 = scmp.lt.s32.totalorder %s1687_s14, %s1680_s10 }
  0x5a   : > { %p1684_p5 = pneg %p1683_p2  ;;  %p1690_p6 = por %p1689_p13, %p1688_p4 }
  0x5c   : > { %p1691_p10 = pnand %p1690_p6, %p1684_p5 }
  0x5e   : > { %1694 = shalt.err (!%p1691_p10)
}
  0x5f   : > { %s1772_s17 = smov 256   ;;  %s1773_s18 = smov 16  }
  0x60   : > { %1446 = dma.hbm_to_vmem [thread:$0]  (!%p1954_p11), %s1950_s13, 1024, %s1952_s15, %s1958_s8, %s1772_s17, %s1772_s17, %s1773_s18  }
  0x61   : > { %257 = sbr.rel (%p1857_p8) target bundleno = 1155 (0x483), region = 44  ;;  %s1989_s9 = sand.u32 (!%p1857_p8), 1, %s1757_s24  }
  0x62   : > { %s1298_s22 = sshll.u32 (!%p1857_p8), %s1989_s9, 6  ;;  %s260_s12 = scalar_lea.sflag (!%p1857_p8), [#allocation4], %s1989_s9 }
  0x63   : > { %s263_s11 = scalar_lea.vmem (!%p1857_p8), [#allocation3], %s1298_s22  ;;  %p2201_p4 = scmp.ne.s32.totalorder (!%p1857_p8), %s2194_s28, 0 }
  0x68   : > { %1740 = dma.done.wait (%p2201_p4), %s260_s12, 1024  }
  0x69   : > { %1742 = vsyncadd (%p2201_p4), %s260_s12, 4294966272  ;;  %p2202_p5 = scmp.eq.s32.totalorder %s1838_s5, 0 }
  0x6b   : > { %1744 = dma.done.wait (%p2202_p5), [#allocation7], 8192   ;;  %p2203_p8 = pmov %p2202_p5 }
  0x6c   : > { %v2003_v0 = vld [vmem:[%s263_s11 + $0x20] sm:$0xff]  ;;  %v2005_v1 = vld [vmem:[%s263_s11 + $0x28] sm:$0xff]  ;;  %v2013_v5 = vld [vmem:[%s263_s11 + $0x30] sm:$0xff]  ;;  %v1774_v17 = vmov 0.0   ;;  %vm1775_vm0 = vmmov 0   ;;  %v351_v19 = vlaneseq  ;;  %vm362_vm1 = vcmask 130112  }
  0x6d   : > { %1746 = vsyncadd (%p2203_p8), [#allocation7], 4294959104  ;;  %v2007_v2 = vld [vmem:[%s263_s11] sm:$0xff]  ;;  %v320_v3 = vadd.f32 %v2005_v1, %v2003_v0  ;;  %v2011_v4 = vld [vmem:[%s263_s11 + $0x8] sm:$0xff]  ;;  %v337_v15 = vmax.f32 %v2003_v0, %v2005_v1  ;;  %1392 = vmatprep.subr.bf16.mxu1 %v1774_v17  ;;  %1408 = vmatprep.subr.bf16.mxu0 %v1774_v17  ;;  %vm369_vm2 = vcmask 195712   ;;  %vm376_vm3 = vcmask 261312  }
  0x6e   : > { %v2015_v6 = vld [vmem:[%s263_s11 + $0x38] sm:$0xff]  ;;  %v314_v7 = vadd.f32 %v2011_v4, %v2007_v2  ;;  %v2019_v8 = vld [vmem:[%s263_s11 + $0x10] sm:$0xff]  ;;  %v331_v13 = vmax.f32 %v2007_v2, %v2011_v4  ;;  %v2038_v16 = vld [vmem:[%s2185_s1] sm:$0xff]   ;;  %1396 = vmatprep.mubr.msk.bf16.mxu1 %vm1775_vm0, %v1774_v17  ;;  %1410 = vmatprep.mubr.msk.bf16.mxu0 %vm1775_vm0, %v1774_v17  ;;  %v352_v20 = vand.u32 127, %v351_v19  ;;  %v2055_v23 = vshrl.u32 %v351_v19, 7  ;;  %s1143_s10 = sld [smem:[#allocation2]] }
  0x6f   : > { %v2021_v9 = vld [vmem:[%s263_s11 + $0x18] sm:$0xff]  ;;  %321 = vadd.xlane.f32.xlu1 %v320_v3  ;;  %v323_v10 = vadd.f32 %v2015_v6, %v2013_v5  ;;  %v340_v14 = vmax.f32 %v2013_v5, %v2015_v6  ;;  %1393 = vmatpush3.bf16.msra.mxu1 %v2038_v16  ;;  %v2047_v18 = vld [vmem:[%s2185_s1 + $0x8] sm:$0xff]   ;;  %vm391_vm4 = vcmask 261120   ;;  %vm514_vm5 = vcmask 1040384   ;;  %s1381_s20 = sshll.u32 %s1838_s5, 10  ;;  %s299_s21 = scalar_lea.vmem [#allocation9], %s1298_s22 }
  0x70   : > { %315 = vadd.xlane.f32.xlu0 %v314_v7  ;;  %v317_v11 = vadd.f32 %v2021_v9, %v2019_v8  ;;  %v334_v12 = vmax.f32 %v2019_v8, %v2021_v9  ;;  %1394 = vmatprep.subr.bf16.mxu1 %v1774_v17  ;;  %v364_v24 = vadd.s32 4294967280, %v352_v20  ;;  %v357_v26 = vadd.s32 4294967288, %v352_v20  ;;  %s1197_s14 = sshll.u32 %s299_s21, 4  ;;  %s2134_s5 = scalar_lea.hbm %s2190_s6, %s1381_s20  ;;  %s2136_s14 = int_to_ptr.vmem [resolvable:$true] %s1197_s14 }
  0x71   : > { %v371_v28 = vadd.s32 4294967272, %v352_v20  ;;  %v355_v35 = vsub.s32 %v352_v20, %v2055_v23  ;;  %vm510_vm6 = vcmask 15360   ;;  %s1184_s22 = scalar_lea.sflag [#allocation5], %s1989_s9  ;;  %s1695_s12 = scalar_lea.vmem %s2136_s14, 1024 }
  0x72   : > { %v367_v33 = vsub.s32 %v364_v24, %v2055_v23  ;;  %v360_v36 = vsub.s32 %v357_v26, %v2055_v23  ;;  %p1696_p11 = scmp.ne.s32.totalorder %s2136_s14, %s1695_s12  ;;  %p2204_p0 = scmp.ne.s32.totalorder %s2199_s27, 0 }
  0x73   : > { %324 = vadd.xlane.f32.xlu1 %v323_v10  ;;  %1395 = vmatpush3.bf16.msra.mxu1 %v2047_v18  ;;  %v374_v39 = vsub.s32 %v371_v28, %v2055_v23  ;;  %s1776_s11 = smov [#allocation9]  }
  0x74   : > { %318 = vadd.xlane.f32.xlu0 %v317_v11  ;;  %1400 = vmatprep.subr.bf16.mxu1 %v1774_v17  ;;  %p1697_p1 = pnand %p1696_p11, %p2204_p0  ;;  %s1699_s28 = sshll.u32 %s1776_s11, 4  ;;  %s1700_s28 = int_to_ptr.vmem [resolvable:$false] %s1699_s28 }
  0x75   : > { %s1701_s30 = scalar_lea.vmem %s1700_s28, 2048  ;;  %p1702_p7 = scmp.lt.s32.totalorder %s2136_s14, %s1700_s28 }
  0x76   : > { %p1698_p3 = pneg %p1697_p1  ;;  %p1703_p9 = scmp.lt.s32.totalorder %s1701_s30, %s1695_s12 }
  0x77   : > { %335 = vmax.xlane.f32.xlu1 %v334_v12 }
  0x78   : > { %332 = vmax.xlane.f32.xlu0 %v331_v13  ;;  %v313_v13 = vld [vmem:[%s2186_s2] sm:$0x1]  ;;  %p1704_p12 = por %p1703_p9, %p1702_p7 }
  0x7a   : > { %p1705_p2 = pnand %p1704_p12, %p1698_p3 }
  0x7b   : > { %341 = vmax.xlane.f32.xlu1 %v340_v14  ;;  %v516_v14 = vsel %vm514_vm5, %v313_v13, 0 }
  0x7c   : > { %338 = vmax.xlane.f32.xlu0 %v337_v15  ;;  %1409 = vmatpush3.bf16.msra.mxu0 %v516_v14 }
  0x7d   : > { %1414 = vmatprep.subr.bf16.mxu0 %v1774_v17 }
  0xfc   : > { %v322_v21 = vpop.xlane.xlu1 %321 }
  0xfd   : > { %v316_v22 = vpop.xlane.xlu0 %315  ;;  %v329_v27 = vmul.f32 0.00390625, %v322_v21 }
  0xfe   : > { %v327_v31 = vmul.f32 0.00390625, %v316_v22 }
 0x100   : > { %v325_v25 = vpop.xlane.xlu1 %324 }
 0x101   : > { %v330_v29 = vmul.f32 0.00390625, %v325_v25  ;;  %v319_v30 = vpop.xlane.xlu0 %318 }
 0x102   : > { %v328_v32 = vmul.f32 0.00390625, %v319_v30  ;;  %v1503_v30 = vld [vmem:[#allocation8 + $0x4] ss:$8 sps:$4 sm:$0xff]  }
 0x103   : > { %v344_v34 = vpack.c.bf16 %v330_v29, %v329_v27  ;;  %v1501_v29 = vld [vmem:[#allocation8] ss:$8 sps:$4 sm:$0xff]  }
 0x104   : > { %v343_v37 = vpack.c.bf16 %v328_v32, %v327_v31  ;;  %v336_v38 = vpop.xlane.xlu1 %335  ;;  %v1504_v31 = vld [vmem:[#allocation6] ss:$8 sps:$4 sm:$0xff]   ;;  %v1506_v32 = vld [vmem:[#allocation6 + $0x4] ss:$8 sps:$4 sm:$0xff]  }
 0x105   : > { %v349_v40 = vunpack.c.l.b16 %v344_v34  ;;  %v350_v41 = vunpack.c.h.b16 %v344_v34  ;;  %v333_v42 = vpop.xlane.xlu0 %332  ;;  %v1512_v34 = vld [vmem:[#allocation6 + $0x14] ss:$8 sps:$4 sm:$0xff]  }
 0x106   : > { %v347_v43 = vunpack.c.l.b16 %v343_v37  ;;  %v348_v44 = vunpack.c.h.b16 %v343_v37  ;;  %v437_v45 = vpack.c.bf16 %v336_v38, %v333_v42  ;;  %v1515_v37 = vld [vmem:[#allocation8 + $0x24] ss:$8 sps:$4 sm:$0xff]   ;;  %v1519_v42 = vld [vmem:[#allocation8 + $0x30] ss:$8 sps:$4 sm:$0xff]  }
 0x107   : > { %v368_v46 = vrot.slane %v349_v40, %v367_v33  ;;  %v375_v52 = vrot.slane %v350_v41, %v374_v39  ;;  %v1518_v38 = vld [vmem:[#allocation6 + $0x24] ss:$8 sps:$4 sm:$0xff]   ;;  %v1521_v40 = vld [vmem:[#allocation8 + $0x34] ss:$8 sps:$4 sm:$0xff]  }
 0x108   : > { %v356_v47 = vrot.slane %v347_v43, %v355_v35  ;;  %v361_v48 = vrot.slane %v348_v44, %v360_v36  ;;  %v441_v49 = vunpack.c.l.b16 %v437_v45  ;;  %v442_v50 = vunpack.c.h.b16 %v437_v45  ;;  %v342_v51 = vpop.xlane.xlu1 %341  ;;  %v1524_v41 = vld [vmem:[#allocation6 + $0x34] ss:$8 sps:$4 sm:$0xff]   ;;  %v1522_v43 = vld [vmem:[#allocation6 + $0x30] ss:$8 sps:$4 sm:$0xff]   ;;  %v1527_v44 = vld [vmem:[#allocation8 + $0x44] ss:$8 sps:$4 sm:$0xff]  }
 0x109   : > { %v339_v53 = vpop.xlane.xlu0 %338  ;;  %v1530_v45 = vld [vmem:[#allocation6 + $0x44] ss:$8 sps:$4 sm:$0xff]  }
 0x10a   : > { %v363_v54 = vsel %vm362_vm1, %v361_v48, %v356_v47  ;;  %v448_v55 = vrot.slane %v441_v49, %v355_v35  ;;  %v452_v56 = vrot.slane %v442_v50, %v360_v36  ;;  %v438_v57 = vpack.c.bf16 %v342_v51, %v339_v53  ;;  %v1507_v35 = vld [vmem:[#allocation8 + $0x10] ss:$8 sps:$4 sm:$0xff]   ;;  %v1528_v47 = vld [vmem:[#allocation6 + $0x40] ss:$8 sps:$4 sm:$0xff]   ;;  %v1533_v48 = vld [vmem:[#allocation8 + $0x54] ss:$8 sps:$4 sm:$0xff]  }
 0x10b   : > { %v370_v58 = vsel %vm369_vm2, %v368_v46, %v363_v54  ;;  %v1510_v36 = vld [vmem:[#allocation6 + $0x10] ss:$8 sps:$4 sm:$0xff]   ;;  %v1525_v46 = vld [vmem:[#allocation8 + $0x40] ss:$8 sps:$4 sm:$0xff]   ;;  %v1536_v49 = vld [vmem:[#allocation6 + $0x54] ss:$8 sps:$4 sm:$0xff]  }
 0x10c   : > { %v443_v59 = vunpack.c.l.b16 %v438_v57  ;;  %v444_v60 = vunpack.c.h.b16 %v438_v57  ;;  %v377_v61 = vsel %vm376_vm3, %v375_v52, %v370_v58  ;;  %v453_v62 = vsel %vm362_vm1, %v452_v56, %v448_v55  ;;  %v1531_v50 = vld [vmem:[#allocation8 + $0x50] ss:$8 sps:$4 sm:$0xff]   ;;  %v1539_v52 = vld [vmem:[#allocation8 + $0x64] ss:$8 sps:$4 sm:$0xff]   ;;  %v1537_v54 = vld [vmem:[#allocation8 + $0x60] ss:$8 sps:$4 sm:$0xff]  }
 0x10d   : > { %v378_v63 = vpack.c.b16 %v377_v61, %v377_v61  ;;  %v1534_v51 = vld [vmem:[#allocation6 + $0x50] ss:$8 sps:$4 sm:$0xff]   ;;  %v1542_v53 = vld [vmem:[#allocation6 + $0x64] ss:$8 sps:$4 sm:$0xff]   ;;  %v1540_v55 = vld [vmem:[#allocation6 + $0x60] ss:$8 sps:$4 sm:$0xff]  }
 0x10e   : > { %v457_v3 = vrot.slane %v443_v59, %v367_v33  ;;  %v462_v7 = vrot.slane %v444_v60, %v374_v39  ;;  %v1509_v33 = vld [vmem:[#allocation8 + $0x14] ss:$8 sps:$4 sm:$0xff]   ;;  %v1516_v39 = vld [vmem:[#allocation6 + $0x20] ss:$8 sps:$4 sm:$0xff]   ;;  %v1543_v58 = vld [vmem:[#allocation8 + $0x70] ss:$8 sps:$4 sm:$0xff]  }
 0x10f   : > { %1397 = vmatmul.mubr.msk.bf16.vlgmr.msra.gmra.mrb[0].mxu1 %vm391_vm4, %v378_v63  ;;  %v1545_v56 = vld [vmem:[#allocation8 + $0x74] ss:$8 sps:$4 sm:$0xff]   ;;  %v1546_v59 = vld [vmem:[#allocation6 + $0x70] ss:$8 sps:$4 sm:$0xff]   ;;  %v1551_v60 = vld [vmem:[#allocation8 + $0x84] ss:$8 sps:$4 sm:$0xff]  }
 0x110   : > { %v458_v10 = vsel %vm369_vm2, %v457_v3, %v453_v62  ;;  %1401 = vmatpush3.bf16.msra.mxu1 %v2038_v16  ;;  %1404 = vmatprep.mubr.msk.bf16.mxu1 %vm1775_vm0, %v1774_v17  ;;  %v1548_v57 = vld [vmem:[#allocation6 + $0x74] ss:$8 sps:$4 sm:$0xff]   ;;  %v1554_v61 = vld [vmem:[#allocation6 + $0x84] ss:$8 sps:$4 sm:$0xff]   ;;  %v1549_v62 = vld [vmem:[#allocation8 + $0x80] ss:$8 sps:$4 sm:$0xff]  }
 0x111   : > { %1402 = vmatprep.subr.bf16.mxu1 %v1774_v17  ;;  %v463_v11 = vsel %vm376_vm3, %v462_v7, %v458_v10  ;;  %v1552_v63 = vld [vmem:[#allocation6 + $0x80] ss:$8 sps:$4 sm:$0xff]  }
 0x112   : > { %v464_v12 = vpack.c.b16 %v463_v11, %v463_v11 }
 0x114   : > { %1403 = vmatpush3.bf16.msra.mxu1 %v2047_v18 }
 0x115   : > { %901 = vmatprep.subr.bf16.mxu1 %v1503_v30 }
 0x117   : > { %1405 = vmatmul.mubr.msk.bf16.vlgmr.msra.gmra.mrb[4].mxu1 %vm391_vm4, %v464_v12 }
 0x118   : > { %902 = vmatpush1.bf16.msra.mxu1 %v1501_v29  ;;  %v1570_v29 = vld [vmem:[#allocation6 + $0xb0] ss:$8 sps:$4 sm:$0xff]  }
 0x119   : > { %903 = vmatprep.subr.bf16.mxu1 %v1509_v33  ;;  %v1578_v33 = vld [vmem:[#allocation6 + $0xc4] ss:$8 sps:$4 sm:$0xff]  }
 0x11c   : > { %904 = vmatpush1.bf16.msra.mxu1 %v1507_v35  ;;  %v1576_v35 = vld [vmem:[#allocation6 + $0xc0] ss:$8 sps:$4 sm:$0xff]  }
 0x11d   : > { %905 = vmatprep.subr.bf16.mxu1 %v1515_v37  ;;  %v1579_v37 = vld [vmem:[#allocation8 + $0xd0] ss:$8 sps:$4 sm:$0xff]  }
 0x1e2   : > { %v429_v15 = vpop.f32.mrb[0].mxu1 }
 0x1e3   : > { %v1398_v16 = vpop.f32.mrb[1].mxu1  ;;  %v435_v27 = vmax.f32 %v429_v15, 0.0  ;;  %v1557_v15 = vld [vmem:[#allocation8 + $0x94] ss:$8 sps:$4 sm:$0xff]  }
 0x1e4   : > { %v432_v19 = vpop.f32.mrb[2].mxu1  ;;  %v1560_v16 = vld [vmem:[#allocation6 + $0x94] ss:$8 sps:$4 sm:$0xff]  }
 0x1e5   : > { %v1399_v20 = vpop.f32.mrb[3].mxu1  ;;  %v436_v28 = vpack.c.bf16 %v435_v27, %v435_v27  ;;  %v1555_v19 = vld [vmem:[#allocation8 + $0x90] ss:$8 sps:$4 sm:$0xff]   ;;  %v1572_v27 = vld [vmem:[#allocation6 + $0xb4] ss:$8 sps:$4 sm:$0xff]  }
 0x1e6   : > { %v1558_v20 = vld [vmem:[#allocation6 + $0x90] ss:$8 sps:$4 sm:$0xff]  }
 0x1ea   : > { %v502_v21 = vpop.f32.mrb[4].mxu1 }
 0x1eb   : > { %v508_v22 = vmax.f32 %v502_v21, 0.0  ;;  %v1406_v24 = vpop.f32.mrb[5].mxu1  ;;  %v1563_v21 = vld [vmem:[#allocation8 + $0xa4] ss:$8 sps:$4 sm:$0xff]  }
 0x1ec   : > { %v505_v25 = vpop.f32.mrb[6].mxu1  ;;  %v1561_v24 = vld [vmem:[#allocation8 + $0xa0] ss:$8 sps:$4 sm:$0xff]  }
 0x1ed   : > { %v509_v18 = vpack.c.bf16 %v508_v22, %v508_v22  ;;  %v1407_v26 = vpop.f32.mrb[7].mxu1  ;;  %v1566_v22 = vld [vmem:[#allocation6 + $0xa4] ss:$8 sps:$4 sm:$0xff]   ;;  %v1564_v25 = vld [vmem:[#allocation6 + $0xa0] ss:$8 sps:$4 sm:$0xff]  }
 0x1ee   : > { %v1569_v26 = vld [vmem:[#allocation8 + $0xb4] ss:$8 sps:$4 sm:$0xff]  }
 0x1ef   : > { %1411 = vmatmul.mubr.msk.bf16.vlgmr.msra.gmra.mrb[0].mxu0 %vm510_vm6, %v509_v18  ;;  %v2079_v18 = vsub.s32 0, %v2055_v23  ;;  %v1581_v23 = vld [vmem:[#allocation8 + $0xd4] ss:$8 sps:$4 sm:$0xff]  }
 0x1f0   : > { %1415 = vmatpush3.bf16.msra.mxu0 %v516_v14  ;;  %1416 = vmatprep.mubr.msk.bf16.mxu0 %vm1775_vm0, %v1774_v17  ;;  %v1513_v17 = vld [vmem:[#allocation8 + $0x20] ss:$8 sps:$4 sm:$0xff]  }
 0x1f1   : > { %1102 = vmatprep.subr.bf16.mxu0 %v1506_v32  ;;  %906 = vmatpush1.bf16.msra.mxu1 %v1513_v17  ;;  %v1575_v32 = vld [vmem:[#allocation8 + $0xc4] ss:$8 sps:$4 sm:$0xff]  }
 0x1f2   : > { %907 = vmatprep.subr.bf16.mxu1 %v1521_v40  ;;  %v1587_v17 = vld [vmem:[#allocation8 + $0xe4] ss:$8 sps:$4 sm:$0xff]   ;;  %v1588_v40 = vld [vmem:[#allocation6 + $0xe0] ss:$8 sps:$4 sm:$0xff]  }
 0x1f5   : > { %908 = vmatpush1.bf16.msra.mxu1 %v1519_v42  ;;  %v1593_v42 = vld [vmem:[#allocation8 + $0xf4] ss:$8 sps:$4 sm:$0xff]  }
 0x1f6   : > { %909 = vmatprep.subr.bf16.mxu1 %v1527_v44  ;;  %v1591_v44 = vld [vmem:[#allocation8 + $0xf0] ss:$8 sps:$4 sm:$0xff]  }
 0x1f9   : > { %910 = vmatpush1.bf16.msra.mxu1 %v1525_v46 }
 0x1fa   : > { %911 = vmatprep.subr.bf16.mxu1 %v1533_v48 }
 0x1fb   : > { %1417 = vmatmul.mubr.msk.bf16.vlgmr.msra.gmra.mrb[0].mxu0 %vm510_vm6, %v436_v28  ;;  %v1567_v28 = vld [vmem:[#allocation8 + $0xb0] ss:$8 sps:$4 sm:$0xff]  }
 0x1fc   : > { %1103 = vmatpush1.bf16.msra.mxu0 %v1504_v31 }
 0x1fd   : > { %1104 = vmatprep.subr.bf16.mxu0 %v1512_v34  ;;  %912 = vmatpush1.bf16.msra.mxu1 %v1531_v50  ;;  %v1573_v34 = vld [vmem:[#allocation8 + $0xc0] ss:$8 sps:$4 sm:$0xff]  }
 0x1fe   : > { %913 = vmatprep.subr.bf16.mxu1 %v1539_v52 }
 0x200   : > { %1105 = vmatpush1.bf16.msra.mxu0 %v1510_v36  ;;  %v1584_v36 = vld [vmem:[#allocation6 + $0xd4] ss:$8 sps:$4 sm:$0xff]  }
 0x201   : > { %1106 = vmatprep.subr.bf16.mxu0 %v1518_v38  ;;  %914 = vmatpush1.bf16.msra.mxu1 %v1537_v54  ;;  %v1582_v38 = vld [vmem:[#allocation6 + $0xd0] ss:$8 sps:$4 sm:$0xff]  }
 0x202   : > { %915 = vmatprep.subr.bf16.mxu1 %v1545_v56 }
 0x204   : > { %1107 = vmatpush1.bf16.msra.mxu0 %v1516_v39  ;;  %v1585_v39 = vld [vmem:[#allocation8 + $0xe0] ss:$8 sps:$4 sm:$0xff]  }
 0x205   : > { %1108 = vmatprep.subr.bf16.mxu0 %v1524_v41  ;;  %916 = vmatpush1.bf16.msra.mxu1 %v1543_v58  ;;  %v1590_v41 = vld [vmem:[#allocation6 + $0xe4] ss:$8 sps:$4 sm:$0xff]  }
 0x206   : > { %917 = vmatprep.subr.bf16.mxu1 %v1551_v60 }
 0x208   : > { %1109 = vmatpush1.bf16.msra.mxu0 %v1522_v43  ;;  %v1596_v43 = vld [vmem:[#allocation6 + $0xf4] ss:$8 sps:$4 sm:$0xff]  }
 0x209   : > { %1110 = vmatprep.subr.bf16.mxu0 %v1530_v45  ;;  %918 = vmatpush1.bf16.msra.mxu1 %v1549_v62  ;;  %v1594_v45 = vld [vmem:[#allocation6 + $0xf0] ss:$8 sps:$4 sm:$0xff]  }
 0x20a   : > { %919 = vmatprep.subr.bf16.mxu1 %v1557_v15 }
 0x20c   : > { %1111 = vmatpush1.bf16.msra.mxu0 %v1528_v47 }
 0x20d   : > { %1112 = vmatprep.subr.bf16.mxu0 %v1536_v49  ;;  %920 = vmatpush1.bf16.msra.mxu1 %v1555_v19 }
 0x20e   : > { %921 = vmatprep.subr.bf16.mxu1 %v1563_v21 }
 0x210   : > { %1113 = vmatpush1.bf16.msra.mxu0 %v1534_v51 }
 0x211   : > { %1114 = vmatprep.subr.bf16.mxu0 %v1542_v53  ;;  %922 = vmatpush1.bf16.msra.mxu1 %v1561_v24 }
 0x212   : > { %923 = vmatprep.subr.bf16.mxu1 %v1569_v26 }
 0x214   : > { %1115 = vmatpush1.bf16.msra.mxu0 %v1540_v55 }
 0x215   : > { %1116 = vmatprep.subr.bf16.mxu0 %v1548_v57  ;;  %924 = vmatpush1.bf16.msra.mxu1 %v1567_v28 }
 0x216   : > { %925 = vmatprep.subr.bf16.mxu1 %v1575_v32 }
 0x218   : > { %1117 = vmatpush1.bf16.msra.mxu0 %v1546_v59 }
 0x219   : > { %1118 = vmatprep.subr.bf16.mxu0 %v1554_v61  ;;  %926 = vmatpush1.bf16.msra.mxu1 %v1573_v34 }
 0x21a   : > { %927 = vmatprep.subr.bf16.mxu1 %v1581_v23 }
 0x21c   : > { %1119 = vmatpush1.bf16.msra.mxu0 %v1552_v63 }
 0x21d   : > { %1120 = vmatprep.subr.bf16.mxu0 %v1560_v16  ;;  %928 = vmatpush1.bf16.msra.mxu1 %v1579_v37 }
 0x21e   : > { %929 = vmatprep.subr.bf16.mxu1 %v1587_v17 }
 0x220   : > { %1121 = vmatpush1.bf16.msra.mxu0 %v1558_v20 }
 0x221   : > { %1122 = vmatprep.subr.bf16.mxu0 %v1566_v22  ;;  %930 = vmatpush1.bf16.msra.mxu1 %v1585_v39  ;;  %v1144_v39 = vstv %s1143_s10 }
 0x222   : > { %931 = vmatprep.subr.bf16.mxu1 %v1593_v42 }
 0x224   : > { %1123 = vmatpush1.bf16.msra.mxu0 %v1564_v25 }
 0x225   : > { %1124 = vmatprep.subr.bf16.mxu0 %v1572_v27  ;;  %932 = vmatpush1.bf16.msra.mxu1 %v1591_v44 }
 0x228   : > { %1125 = vmatpush1.bf16.msra.mxu0 %v1570_v29 }
 0x229   : > { %1126 = vmatprep.subr.bf16.mxu0 %v1578_v33 }
 0x22c   : > { %1127 = vmatpush1.bf16.msra.mxu0 %v1576_v35 }
 0x22d   : > { %1128 = vmatprep.subr.bf16.mxu0 %v1584_v36 }
 0x230   : > { %1129 = vmatpush1.bf16.msra.mxu0 %v1582_v38 }
 0x231   : > { %1130 = vmatprep.subr.bf16.mxu0 %v1590_v41 }
 0x234   : > { %1131 = vmatpush1.bf16.msra.mxu0 %v1588_v40 }
 0x235   : > { %1132 = vmatprep.subr.bf16.mxu0 %v1596_v43 }
 0x238   : > { %1133 = vmatpush1.bf16.msra.mxu0 %v1594_v45 }
 0x2ce   : > { %v595_v3 = vpop.f32.mrb[0].mxu0 }
 0x2cf   : > { %v1308_v7 = vmul.f32 -1.442695, %v595_v3  ;;  %v1418_v10 = vpop.f32.mrb[1].mxu0 }
 0x2d0   : > { %v598_v11 = vpop.f32.mrb[2].mxu0 }
 0x2d1   : > { %1597 = vpow2.f32 %v1308_v7  ;;  %v1419_v12 = vpop.f32.mrb[3].mxu0 }
 0x2db   : > { %v1598_v13 = vpop.eup %1597 }
 0x2dc   : > { %v604_v14 = vadd.f32 1.0, %v1598_v13 }
 0x2de   : > { %1599 = vrcp.f32 %v604_v14 }
 0x2e8   : > { %v1600_v30 = vpop.eup %1599 }
 0x2e9   : > { %v610_v31 = vrot.slane %v1600_v30, %v2079_v18 }
 0x2eb   : > { %616 = vbcast.lane.b32.xlu1 %v610_v31, 264  ;;  %612 = vbcast.lane.b32.xlu0 %v610_v31, 256 }
 0x2ef   : > { %620 = vbcast.lane.b32.xlu1 %v610_v31, 272 }
 0x2f3   : > { %624 = vbcast.lane.b32.xlu1 %v610_v31, 280 }
 0x35d   : > { %v617_v46 = vpop.permute.xlu1 %616  ;;  %v613_v47 = vpop.permute.xlu0 %612 }
 0x35e   : > { %v2083_v48 = vmul.f32 %v617_v46, %v2019_v8  ;;  %v2086_v49 = vmul.f32 %v617_v46, %v2021_v9  ;;  %v2089_v50 = vmul.f32 %v613_v47, %v2007_v2  ;;  %v2092_v51 = vmul.f32 %v613_v47, %v2011_v4 }
 0x360   : > { %v634_v8 = vadd.f32 %v2083_v48, %v2089_v50  ;;  %v643_v9 = vadd.f32 %v2086_v49, %v2092_v51 }
 0x361   : > { %v621_v52 = vpop.permute.xlu1 %620 }
 0x362   : > { %v2095_v53 = vmul.f32 %v621_v52, %v2003_v0  ;;  %v2098_v54 = vmul.f32 %v621_v52, %v2005_v1 }
 0x364   : > { %v635_v2 = vadd.f32 %v634_v8, %v2095_v53  ;;  %v644_v56 = vadd.f32 %v643_v9, %v2098_v54  ;;  %v655_v1 = vmax.f32 %v2089_v50, %v2095_v53  ;;  %v664_v57 = vmax.f32 %v2092_v51, %v2098_v54 }
 0x365   : > { %v625_v55 = vpop.permute.xlu1 %624 }
 0x366   : > { %v2107_v4 = vmul.f32 %v625_v55, %v2013_v5  ;;  %v2110_v0 = vmul.f32 %v625_v55, %v2015_v6 }
 0x368   : > { %v636_v58 = vadd.f32 %v635_v2, %v2107_v4  ;;  %v645_v59 = vadd.f32 %v644_v56, %v2110_v0  ;;  %v656_v60 = vmax.f32 %v2083_v48, %v2107_v4  ;;  %v665_v5 = vmax.f32 %v2086_v49, %v2110_v0 }
 0x36a   : > { %v637_v61 = vrot.slane %v636_v58, 4  ;;  %v646_v62 = vrot.slane %v645_v59, 4  ;;  %v657_v6 = vmax.f32 %v655_v1, %v656_v60  ;;  %v666_v63 = vmax.f32 %v664_v57, %v665_v5 }
 0x36c   : > { %v638_v3 = vadd.f32 %v637_v61, %v636_v58  ;;  %v647_v7 = vadd.f32 %v646_v62, %v645_v59  ;;  %v658_v10 = vrot.slane %v657_v6, 4  ;;  %v667_v11 = vrot.slane %v666_v63, 4 }
 0x36e   : > { %v639_v12 = vrot.slane %v638_v3, 2  ;;  %v659_v13 = vmax.f32 %v657_v6, %v658_v10  ;;  %v668_v14 = vmax.f32 %v666_v63, %v667_v11  ;;  %v648_v15 = vrot.slane %v647_v7, 2 }
 0x370   : > { %v640_v16 = vadd.f32 %v639_v12, %v638_v3  ;;  %v660_v19 = vrot.slane %v659_v13, 2  ;;  %v669_v20 = vrot.slane %v668_v14, 2  ;;  %v649_v21 = vadd.f32 %v648_v15, %v647_v7 }
 0x372   : > { %v670_v22 = vmax.f32 %v668_v14, %v669_v20  ;;  %v650_v24 = vrot.slane %v649_v21, 1  ;;  %v661_v25 = vmax.f32 %v659_v13, %v660_v19  ;;  %v641_v26 = vrot.slane %v640_v16, 1 }
 0x374   : > { %v671_v27 = vrot.slane %v670_v22, 1  ;;  %v651_v28 = vadd.f32 %v650_v24, %v649_v21  ;;  %v662_v29 = vrot.slane %v661_v25, 1  ;;  %v642_v30 = vadd.f32 %v641_v26, %v640_v16 }
 0x376   : > { %v672_v31 = vmax.f32 %v670_v22, %v671_v27  ;;  %v654_v32 = vmul.f32 0.03125, %v651_v28  ;;  %v663_v33 = vmax.f32 %v661_v25, %v662_v29  ;;  %v653_v34 = vmul.f32 0.03125, %v642_v30 }
 0x378   : > { %v708_v35 = vpack.c.bf16 %v672_v31, %v672_v31  ;;  %v674_v23 = vpack.c.bf16 %v654_v32, %v654_v32  ;;  %v707_v36 = vpack.c.bf16 %v663_v33, %v663_v33  ;;  %v673_v37 = vpack.c.bf16 %v653_v34, %v653_v34 }
 0x37a   : > { %933 = vmatprep.mubr.bf16.mxu1 %v708_v35  ;;  %1134 = vmatprep.mubr.bf16.mxu0 %v674_v23 }
 0x37b   : > { %934 = vmatmul.mubr.bf16.vlgmr.msra.gmra.mrb[8].mxu1 %v707_v36  ;;  %1135 = vmatmul.mubr.bf16.vlgmr.msra.gmra.mrb[4].mxu0 %v673_v37 }
 0x44e   : > { %v935_v38 = vpop.f32.mrb[8].mxu1  ;;  %v1136_v17 = vpop.f32.mrb[4].mxu0 }
 0x44f   : > { %v1137_v40 = vadd.f32 %v1136_v17, %v935_v38  ;;  %v937_v41 = vpop.f32.mrb[9].mxu1  ;;  %v1138_v42 = vpop.f32.mrb[5].mxu0 }
 0x450   : > { %v1139_v43 = vadd.f32 %v1138_v42, %v937_v41  ;;  %v939_v44 = vpop.f32.mrb[10].mxu1  ;;  %v1140_v45 = vpop.f32.mrb[6].mxu0 }
 0x451   : > { %v1145_v46 = vadd.f32 %v1144_v39, %v1137_v40  ;;  %v940_v47 = vpop.f32.mrb[11].mxu1  ;;  %v1141_v52 = vpop.f32.mrb[7].mxu0 }
 0x452   : > { %v1146_v8 = vadd.f32 %v1144_v39, %v1139_v43 }
 0x453   : > { %v1373_v9 = vmul.f32 -1.442695, %v1145_v46 }
 0x454   : > { %v1374_v55 = vmul.f32 -1.442695, %v1146_v8 }
 0x455   : > { %1601 = vpow2.f32 %v1373_v9 }
 0x456   : > { %1603 = vpow2.f32 %v1374_v55 }
 0x45f   : > { %v1602_v2 = vpop.eup %1601 }
 0x460   : > { %v1604_v56 = vpop.eup %1603  ;;  %v1153_v1 = vadd.f32 1.0, %v1602_v2 }
 0x461   : > { %v1154_v57 = vadd.f32 1.0, %v1604_v56 }
 0x462   : > { %1605 = vrcp.f32 %v1153_v1 }
 0x463   : > { %1607 = vrcp.f32 %v1154_v57 }
 0x46c   : > { %v1606_v58 = vpop.eup %1605 }
 0x46d   : > { %v1608_v59 = vpop.eup %1607  ;;  %v1162_v60 = vrot.slane %v1606_v58, %v2079_v18 }
 0x46e   : > { %v1166_v5 = vrot.slane %v1608_v59, %v2079_v18 }
 0x46f   : > { %v1167_v61 = vmul.f32 %v1162_v60, %v2089_v50  ;;  %v1169_v62 = vmul.f32 %v1162_v60, %v2083_v48  ;;  %v1171_v6 = vmul.f32 %v1162_v60, %v2095_v53  ;;  %v1173_v63 = vmul.f32 %v1162_v60, %v2107_v4 }
 0x470   : > { %v1168_v18 = vmul.f32 %v1166_v5, %v2092_v51  ;;  %v1170_v50 = vmul.f32 %v1166_v5, %v2086_v49  ;;  %v1172_v48 = vmul.f32 %v1166_v5, %v2098_v54  ;;  %v1174_v53 = vmul.f32 %v1166_v5, %v2110_v0 }
 0x471   : > { %1175 = vst [vmem:[%s299_s21] sm:$0xff] %v1167_v61  ;;  %1177 = vst [vmem:[%s299_s21 + $0x10] sm:$0xff] %v1169_v62 }
 0x472   : > { %1179 = vst [vmem:[%s299_s21 + $0x20] sm:$0xff] %v1171_v6  ;;  %1181 = vst [vmem:[%s299_s21 + $0x30] sm:$0xff] %v1173_v63 }
 0x473   : > { %1176 = vst [vmem:[%s299_s21 + $0x8] sm:$0xff] %v1168_v18  ;;  %1178 = vst [vmem:[%s299_s21 + $0x18] sm:$0xff] %v1170_v50 }
 0x474   : > { %1180 = vst [vmem:[%s299_s21 + $0x28] sm:$0xff] %v1172_v48  ;;  %1182 = vst [vmem:[%s299_s21 + $0x38] sm:$0xff] %v1174_v53 }
 0x475   : > { %1708 = shalt.err (!%p1705_p2)
}
 0x476   : > { %s1709_s13 = scalar_lea.hbm %s2134_s5, 1024  ;;  %s1713_s8 = scalar_lea.hbm %s2190_s6, 2048 }
 0x477   : > { %p1710_p13 = scmp.ne.s32.totalorder %s2134_s5, %s1709_s13  ;;  %p1714_p4 = scmp.lt.u32.totalorder %s2134_s5, %s2190_s6 }
 0x478   : > { %p1715_p5 = scmp.lt.u32.totalorder %s1713_s8, %s1709_s13  ;;  %p1717_p11 = scmp.lt.u32.totalorder %s1709_s13, %s2134_s5 }
 0x479   : > { %p1711_p6 = pnand %p1710_p13, %p2204_p0 }
 0x47a   : > { %p1716_p8 = por %p1715_p5, %p1714_p4 }
 0x47b   : > { %p1712_p10 = pneg %p1711_p6 }
 0x47c   : > { %p1718_p1 = por %p1717_p11, %p1716_p8 }
 0x47e   : > { %p1719_p3 = pnand %p1718_p1, %p1712_p10 }
 0x480   : > { %1722 = shalt.err (!%p1719_p3)
}
 0x481   : > { %s1777_s21 = smov 256   ;;  %s1778_s17 = smov 16  }
 0x482   : > { %1434 = dma.vmem_to_hbm [thread:$0]  (%p2204_p0), %s2136_s14, 1024, %s2134_s5, %s1184_s22, %s1777_s21, %s1777_s21, %s1778_s17  }
 0x483 PF: > { %s1212_s18 = sand.u32 1, %s1753_s23   ;;  %p2205_p7 = scmp.ne.s32.totalorder %s2195_s29, 0 }
 0x484   : > { %p2206_p9 = scmp.ge.s32.totalorder %s1765_s26, 2  ;;  %s1213_s12 = scalar_lea.sflag [#allocation5], %s1212_s18 }
 0x486   : > { %p1448_p12 = pnand %p2206_p9, %p2205_p7 }
 0x488   : > { %1748 = dma.done.wait (!%p1448_p12), %s1213_s12, 1024  }
 0x489   : > { %1750 = vsyncadd (!%p1448_p12), %s1213_s12, 4294966272  ;;  %p21_p2 = scmp.ge.s32.totalorder %s1927_s19, 4   ;;  %s2207_s23 = smov %s1757_s24 }
 0x48a   : > { %s2208_s24 = smov %s1761_s25  ;;  %s2209_s25 = smov %s1943_s7 }
 0x48b   : > { %s2210_s26 = smov %s1927_s19  ;;  %23 = sbr.rel (!%p21_p2) target bundleno = 8 (0x8), region = 97 }
 0x492   :  { %1218 = vsyncpa [#allocation4], 1 }
 0x493   :  { %1220 = vsyncpa [#allocation4 + $0x1], 1 }
 0x494   :  { %1221 = vsyncpa [#allocation7], 1 }
 0x495   :  { %1222 = vsyncpa [#allocation5], 1 }
 0x496   :  { %1224 = vsyncpa [#allocation5 + $0x1], 1 }

</bundles_post_ra>
